<compile_context>
chip_gen: v6e
topology: v6e:2x2x1
jax: 0.10.0
libtpu: 0.0.40
codegen_flags: <defaults>
</compile_context>

<pallas_src>
import functools

import jax
import jax.numpy as jnp
from jax.experimental import pallas as pl
from jax.experimental.pallas import tpu as pltpu

_VMEM_TABLE_BUDGET = 8 * 1024 * 1024   # resident-table path if table <= 8 MiB
_MAX_ROWS_RESIDENT = 128               # rows gathered per grid step (VMEM path)
_MAX_ROWS_HBM = 64                     # row DMAs in flight per step (HBM path)


def _round_up(x, m):
    return (x + m - 1) // m * m


def _sublane_pack(dtype):
    # f32 -> 8, bf16 -> 16, int8/fp8 -> 32 (keep blocks a multiple of the pack)
    return max(8, 32 // jnp.dtype(dtype).itemsize)


def _vmem_gather_kernel(ids_ref, table_ref, out_ref, *,
                        rows_per_step, total_rows, num_steps, vocab):
    # ids_ref:   (Lp,) int32 in SMEM (scalar prefetch; addressing only)
    # table_ref: (V, D) table, VMEM-resident (constant index_map -> fetched once)
    # out_ref:   (rows_per_step, D) pipelined output block in VMEM
    base = pl.program_id(0) * rows_per_step

    def copy_row(r):
        row_id = ids_ref[base + r]
        # Clamp in-kernel on the scalar unit (jnp.take "clip" semantics; also
        # keeps every VMEM read in bounds).
        row_id = jnp.minimum(jnp.maximum(row_id, 0), vocab - 1)
        out_ref[pl.ds(r, 1), :] = table_ref[pl.ds(row_id, 1), :]

    for r in range(rows_per_step):
        # Only rows that can actually run past the end (last step's tail) get a
        # runtime guard; everything else is unconditional.
        if (num_steps - 1) * rows_per_step + r >= total_rows:
            @pl.when(base + r < total_rows)
            def _(r=r):
                copy_row(r)
        else:
            copy_row(r)


def _hbm_gather_kernel(ids_ref, table_ref, out_ref, copy_sems, *,
                       rows_per_step, vocab):
    # ids_ref:   (Lp,) int32 in SMEM (scalar prefetch)
    # table_ref: (V, D) embedding table left in HBM (memory_space=pl.ANY)
    # out_ref:   (rows_per_step, D) pipelined output block in VMEM
    # copy_sems: (rows_per_step,) DMA semaphores
    base = pl.program_id(0) * rows_per_step

    # Read every id and build every descriptor before the first .wait() so the
    # scalar path stays fast; reuse the same descriptors for the drain.
    copies = []
    for r in range(rows_per_step):
        row_id = ids_ref[base + r]
        row_id = jnp.minimum(jnp.maximum(row_id, 0), vocab - 1)
        copies.append(pltpu.make_async_copy(
            table_ref.at[pl.ds(row_id, 1), :],   # one (1, D) row from HBM
            out_ref.at[pl.ds(r, 1), :],          # directly into the out block
            copy_sems.at[r],
        ))
    for c in copies:   # issue: rows_per_step row DMAs in flight
        c.start()
    for c in copies:   # drain
        c.wait()


def _embedding_lookup(ids_flat, table):
    """Pallas row gather: ids (L,) int, table (V, D) -> (L, D)."""
    L = int(ids_flat.shape[0])
    V, D = int(table.shape[0]), int(table.shape[1])
    itemsize = jnp.dtype(table.dtype).itemsize
    table_bytes = V * D * itemsize
    resident = table_bytes <= _VMEM_TABLE_BUDGET

    pack = _sublane_pack(table.dtype)
    max_rows = _MAX_ROWS_RESIDENT if resident else _MAX_ROWS_HBM
    rows_per_step = min(_round_up(L, pack), _round_up(max_rows, pack))
    num_steps = -(-L // rows_per_step)
    Lp = num_steps * rows_per_step

    ids = ids_flat.reshape(-1).astype(jnp.int32)
    if Lp != L:
        # Pad ids with 0; pad rows are either skipped (pl.when, VMEM path) or
        # gather row 0 harmlessly (HBM path) and are sliced off below.
        ids = jnp.pad(ids, (0, Lp - L))

    if resident:
        kernel = functools.partial(
            _vmem_gather_kernel, rows_per_step=rows_per_step,
            total_rows=L, num_steps=num_steps, vocab=V)
        table_spec = pl.BlockSpec((V, D), lambda i, ids_ref: (0, 0))
        scratch = []
        bytes_accessed = Lp * 4 + table_bytes + Lp * D * itemsize
    else:
        kernel = functools.partial(
            _hbm_gather_kernel, rows_per_step=rows_per_step, vocab=V)
        table_spec = pl.BlockSpec(memory_space=pl.ANY)   # table stays in HBM
        scratch = [pltpu.SemaphoreType.DMA((rows_per_step,))]
        bytes_accessed = Lp * 4 + 2 * Lp * D * itemsize

    out = pl.pallas_call(
        kernel,
        out_shape=jax.ShapeDtypeStruct((Lp, D), table.dtype),
        grid_spec=pltpu.PrefetchScalarGridSpec(
            num_scalar_prefetch=1,                    # ids -> SMEM
            grid=(num_steps,),
            in_specs=[table_spec],
            out_specs=pl.BlockSpec((rows_per_step, D),
                                   lambda i, ids_ref: (i, 0)),
            scratch_shapes=scratch,
        ),
        compiler_params=pltpu.CompilerParams(
            dimension_semantics=("parallel",),
            vmem_limit_bytes=32 * 1024 * 1024,
        ),
        cost_estimate=pl.CostEstimate(
            flops=0, transcendentals=0, bytes_accessed=int(bytes_accessed)),
    )(ids, table)
    return out[:L] if Lp != L else out


class NaiveEmbedding:
    """JAX/Pallas port of the PyTorch NaiveEmbedding module."""

    def __init__(self, num_nodes, num_edges, node_dim, edge_dim,
                 mask_node, mask_edge, key=None):
        self.num_nodes = num_nodes
        self.num_edges = num_edges
        self.node_dim = node_dim
        self.edge_dim = edge_dim
        self.mask_node = mask_node
        self.mask_edge = mask_edge
        if key is None:
            key = jax.random.PRNGKey(0)
        k_node, k_edge = jax.random.split(key)
        # nn.Embedding default init: N(0, 1)
        if not self.mask_node:
            self.emb_nodes = jax.random.normal(
                k_node, (num_nodes, node_dim), dtype=jnp.float32)
        if not self.mask_edge:
            self.emb_edges = jax.random.normal(
                k_edge, (num_edges, edge_dim), dtype=jnp.float32)

    def __call__(self, nodes, edges):
        nodes_embeddings, edges_embeddings = None, None
        if not self.mask_node:
            flat = nodes.reshape(-1)
            out = _embedding_lookup(flat, self.emb_nodes)
            nodes_embeddings = out.reshape(nodes.shape + (self.node_dim,))
        if not self.mask_edge:
            flat = edges.reshape(-1)
            out = _embedding_lookup(flat, self.emb_edges)
            edges_embeddings = out.reshape(edges.shape + (self.edge_dim,))
        # Matches the reference PyTorch module, which asserts both lookups ran.
        assert nodes_embeddings is not None and edges_embeddings is not None
        return nodes_embeddings, edges_embeddings


if __name__ == "__main__":
    key = jax.random.PRNGKey(0)
    k_model, k_nodes, k_edges = jax.random.split(key, 3)

    num_nodes, num_edges = 32, 16
    node_dim, edge_dim = 32, 16
    batch, node_seq, edge_seq = 2, 8, 12

    model = NaiveEmbedding(num_nodes, num_edges, node_dim, edge_dim,
                           mask_node=False, mask_edge=False, key=k_model)

    nodes = jax.random.randint(k_nodes, (batch, node_seq), 0, num_nodes,
                               dtype=jnp.int32)
    edges = jax.random.randint(k_edges, (batch, edge_seq), 0, num_edges,
                               dtype=jnp.int32)

    node_emb, edge_emb = model(nodes, edges)
    jax.block_until_ready((node_emb, edge_emb))

    # sanity check against pure-JAX gather reference
    ref_node = jnp.take(model.emb_nodes, nodes, axis=0)
    ref_edge = jnp.take(model.emb_edges, edges, axis=0)
    assert node_emb.shape == (batch, node_seq, node_dim)
    assert edge_emb.shape == (batch, edge_seq, edge_dim)
    assert jnp.allclose(node_emb, ref_node, atol=1e-6)
    assert jnp.allclose(edge_emb, ref_edge, atol=1e-6)

    print("KERNEL_OK")
</pallas_src>

<mosaic_0001>
module attributes {stable_mosaic.version = 11 : i64} {
  func.func @_vmem_gather_kernel(%arg0: i32, %arg1: memref<16xi32, #tpu.memory_space<smem>>, %arg2: memref<32x32xf32, #tpu.memory_space<vmem>>, %arg3: memref<16x32xf32, #tpu.memory_space<vmem>>) attributes {dimension_semantics = [#tpu.dimension_semantics<parallel>], iteration_bounds = array<i64: 1>, scalar_prefetch = 1 : i64, scratch_operands = 0 : i64, tpu.core_type = #tpu.core_type<tc>, window_params = [{pipeline_mode = #tpu.pipeline_mode<synchronous>, transform_indices = @transform_0, window_bounds = array<i64: 32, 32>}, {transform_indices = @transform_1, window_bounds = array<i64: 16, 32>}]} {
    %c16_i32 = arith.constant 16 : i32
    %0 = arith.muli %arg0, %c16_i32 : i32
    %c0_i32 = arith.constant 0 : i32
    %1 = arith.addi %0, %c0_i32 : i32
    %2 = arith.index_cast %1 : i32 to index
    %3 = memref.load %arg1[%2] : memref<16xi32, #tpu.memory_space<smem>>
    %c0_i32_0 = arith.constant 0 : i32
    %4 = arith.maxsi %3, %c0_i32_0 : i32
    %c31_i32 = arith.constant 31 : i32
    %5 = arith.minsi %4, %c31_i32 : i32
    %6 = arith.index_cast %5 : i32 to index
    %c0 = arith.constant 0 : index
    %7 = vector.load %arg2[%6, %c0] : memref<32x32xf32, #tpu.memory_space<vmem>>, vector<1x32xf32>
    %c0_1 = arith.constant 0 : index
    %c0_2 = arith.constant 0 : index
    %8 = vector.load %arg3[%c0_1, %c0_2] : memref<16x32xf32, #tpu.memory_space<vmem>>, vector<1x32xf32>
    tpu.vector_store %arg3[%c0_1, %c0_2], %7 {strides = array<i32>} : memref<16x32xf32, #tpu.memory_space<vmem>>, vector<1x32xf32>,
    %c1_i32 = arith.constant 1 : i32
    %9 = arith.addi %0, %c1_i32 : i32
    %10 = arith.index_cast %9 : i32 to index
    %11 = memref.load %arg1[%10] : memref<16xi32, #tpu.memory_space<smem>>
    %c0_i32_3 = arith.constant 0 : i32
    %12 = arith.maxsi %11, %c0_i32_3 : i32
    %c31_i32_4 = arith.constant 31 : i32
    %13 = arith.minsi %12, %c31_i32_4 : i32
    %14 = arith.index_cast %13 : i32 to index
    %c0_5 = arith.constant 0 : index
    %15 = vector.load %arg2[%14, %c0_5] : memref<32x32xf32, #tpu.memory_space<vmem>>, vector<1x32xf32>
    %c1 = arith.constant 1 : index
    %c0_6 = arith.constant 0 : index
    %16 = vector.load %arg3[%c1, %c0_6] : memref<16x32xf32, #tpu.memory_space<vmem>>, vector<1x32xf32>
    tpu.vector_store %arg3[%c1, %c0_6], %15 {strides = array<i32>} : memref<16x32xf32, #tpu.memory_space<vmem>>, vector<1x32xf32>,
    %c2_i32 = arith.constant 2 : i32
    %17 = arith.addi %0, %c2_i32 : i32
    %18 = arith.index_cast %17 : i32 to index
    %19 = memref.load %arg1[%18] : memref<16xi32, #tpu.memory_space<smem>>
    %c0_i32_7 = arith.constant 0 : i32
    %20 = arith.maxsi %19, %c0_i32_7 : i32
    %c31_i32_8 = arith.constant 31 : i32
    %21 = arith.minsi %20, %c31_i32_8 : i32
    %22 = arith.index_cast %21 : i32 to index
    %c0_9 = arith.constant 0 : index
    %23 = vector.load %arg2[%22, %c0_9] : memref<32x32xf32, #tpu.memory_space<vmem>>, vector<1x32xf32>
    %c2 = arith.constant 2 : index
    %c0_10 = arith.constant 0 : index
    %24 = vector.load %arg3[%c2, %c0_10] : memref<16x32xf32, #tpu.memory_space<vmem>>, vector<1x32xf32>
    tpu.vector_store %arg3[%c2, %c0_10], %23 {strides = array<i32>} : memref<16x32xf32, #tpu.memory_space<vmem>>, vector<1x32xf32>,
    %c3_i32 = arith.constant 3 : i32
    %25 = arith.addi %0, %c3_i32 : i32
    %26 = arith.index_cast %25 : i32 to index
    %27 = memref.load %arg1[%26] : memref<16xi32, #tpu.memory_space<smem>>
    %c0_i32_11 = arith.constant 0 : i32
    %28 = arith.maxsi %27, %c0_i32_11 : i32
    %c31_i32_12 = arith.constant 31 : i32
    %29 = arith.minsi %28, %c31_i32_12 : i32
    %30 = arith.index_cast %29 : i32 to index
    %c0_13 = arith.constant 0 : index
    %31 = vector.load %arg2[%30, %c0_13] : memref<32x32xf32, #tpu.memory_space<vmem>>, vector<1x32xf32>
    %c3 = arith.constant 3 : index
    %c0_14 = arith.constant 0 : index
    %32 = vector.load %arg3[%c3, %c0_14] : memref<16x32xf32, #tpu.memory_space<vmem>>, vector<1x32xf32>
    tpu.vector_store %arg3[%c3, %c0_14], %31 {strides = array<i32>} : memref<16x32xf32, #tpu.memory_space<vmem>>, vector<1x32xf32>,
    %c4_i32 = arith.constant 4 : i32
    %33 = arith.addi %0, %c4_i32 : i32
    %34 = arith.index_cast %33 : i32 to index
    %35 = memref.load %arg1[%34] : memref<16xi32, #tpu.memory_space<smem>>
    %c0_i32_15 = arith.constant 0 : i32
    %36 = arith.maxsi %35, %c0_i32_15 : i32
    %c31_i32_16 = arith.constant 31 : i32
    %37 = arith.minsi %36, %c31_i32_16 : i32
    %38 = arith.index_cast %37 : i32 to index
    %c0_17 = arith.constant 0 : index
    %39 = vector.load %arg2[%38, %c0_17] : memref<32x32xf32, #tpu.memory_space<vmem>>, vector<1x32xf32>
    %c4 = arith.constant 4 : index
    %c0_18 = arith.constant 0 : index
    %40 = vector.load %arg3[%c4, %c0_18] : memref<16x32xf32, #tpu.memory_space<vmem>>, vector<1x32xf32>
    tpu.vector_store %arg3[%c4, %c0_18], %39 {strides = array<i32>} : memref<16x32xf32, #tpu.memory_space<vmem>>, vector<1x32xf32>,
    %c5_i32 = arith.constant 5 : i32
    %41 = arith.addi %0, %c5_i32 : i32
    %42 = arith.index_cast %41 : i32 to index
    %43 = memref.load %arg1[%42] : memref<16xi32, #tpu.memory_space<smem>>
    %c0_i32_19 = arith.constant 0 : i32
    %44 = arith.maxsi %43, %c0_i32_19 : i32
    %c31_i32_20 = arith.constant 31 : i32
    %45 = arith.minsi %44, %c31_i32_20 : i32
    %46 = arith.index_cast %45 : i32 to index
    %c0_21 = arith.constant 0 : index
    %47 = vector.load %arg2[%46, %c0_21] : memref<32x32xf32, #tpu.memory_space<vmem>>, vector<1x32xf32>
    %c5 = arith.constant 5 : index
    %c0_22 = arith.constant 0 : index
    %48 = vector.load %arg3[%c5, %c0_22] : memref<16x32xf32, #tpu.memory_space<vmem>>, vector<1x32xf32>
    tpu.vector_store %arg3[%c5, %c0_22], %47 {strides = array<i32>} : memref<16x32xf32, #tpu.memory_space<vmem>>, vector<1x32xf32>,
    %c6_i32 = arith.constant 6 : i32
    %49 = arith.addi %0, %c6_i32 : i32
    %50 = arith.index_cast %49 : i32 to index
    %51 = memref.load %arg1[%50] : memref<16xi32, #tpu.memory_space<smem>>
    %c0_i32_23 = arith.constant 0 : i32
    %52 = arith.maxsi %51, %c0_i32_23 : i32
    %c31_i32_24 = arith.constant 31 : i32
    %53 = arith.minsi %52, %c31_i32_24 : i32
    %54 = arith.index_cast %53 : i32 to index
    %c0_25 = arith.constant 0 : index
    %55 = vector.load %arg2[%54, %c0_25] : memref<32x32xf32, #tpu.memory_space<vmem>>, vector<1x32xf32>
    %c6 = arith.constant 6 : index
    %c0_26 = arith.constant 0 : index
    %56 = vector.load %arg3[%c6, %c0_26] : memref<16x32xf32, #tpu.memory_space<vmem>>, vector<1x32xf32>
    tpu.vector_store %arg3[%c6, %c0_26], %55 {strides = array<i32>} : memref<16x32xf32, #tpu.memory_space<vmem>>, vector<1x32xf32>,
    %c7_i32 = arith.constant 7 : i32
    %57 = arith.addi %0, %c7_i32 : i32
    %58 = arith.index_cast %57 : i32 to index
    %59 = memref.load %arg1[%58] : memref<16xi32, #tpu.memory_space<smem>>
    %c0_i32_27 = arith.constant 0 : i32
    %60 = arith.maxsi %59, %c0_i32_27 : i32
    %c31_i32_28 = arith.constant 31 : i32
    %61 = arith.minsi %60, %c31_i32_28 : i32
    %62 = arith.index_cast %61 : i32 to index
    %c0_29 = arith.constant 0 : index
    %63 = vector.load %arg2[%62, %c0_29] : memref<32x32xf32, #tpu.memory_space<vmem>>, vector<1x32xf32>
    %c7 = arith.constant 7 : index
    %c0_30 = arith.constant 0 : index
    %64 = vector.load %arg3[%c7, %c0_30] : memref<16x32xf32, #tpu.memory_space<vmem>>, vector<1x32xf32>
    tpu.vector_store %arg3[%c7, %c0_30], %63 {strides = array<i32>} : memref<16x32xf32, #tpu.memory_space<vmem>>, vector<1x32xf32>,
    %c8_i32 = arith.constant 8 : i32
    %65 = arith.addi %0, %c8_i32 : i32
    %66 = arith.index_cast %65 : i32 to index
    %67 = memref.load %arg1[%66] : memref<16xi32, #tpu.memory_space<smem>>
    %c0_i32_31 = arith.constant 0 : i32
    %68 = arith.maxsi %67, %c0_i32_31 : i32
    %c31_i32_32 = arith.constant 31 : i32
    %69 = arith.minsi %68, %c31_i32_32 : i32
    %70 = arith.index_cast %69 : i32 to index
    %c0_33 = arith.constant 0 : index
    %71 = vector.load %arg2[%70, %c0_33] : memref<32x32xf32, #tpu.memory_space<vmem>>, vector<1x32xf32>
    %c8 = arith.constant 8 : index
    %c0_34 = arith.constant 0 : index
    %72 = vector.load %arg3[%c8, %c0_34] : memref<16x32xf32, #tpu.memory_space<vmem>>, vector<1x32xf32>
    tpu.vector_store %arg3[%c8, %c0_34], %71 {strides = array<i32>} : memref<16x32xf32, #tpu.memory_space<vmem>>, vector<1x32xf32>,
    %c9_i32 = arith.constant 9 : i32
    %73 = arith.addi %0, %c9_i32 : i32
    %74 = arith.index_cast %73 : i32 to index
    %75 = memref.load %arg1[%74] : memref<16xi32, #tpu.memory_space<smem>>
    %c0_i32_35 = arith.constant 0 : i32
    %76 = arith.maxsi %75, %c0_i32_35 : i32
    %c31_i32_36 = arith.constant 31 : i32
    %77 = arith.minsi %76, %c31_i32_36 : i32
    %78 = arith.index_cast %77 : i32 to index
    %c0_37 = arith.constant 0 : index
    %79 = vector.load %arg2[%78, %c0_37] : memref<32x32xf32, #tpu.memory_space<vmem>>, vector<1x32xf32>
    %c9 = arith.constant 9 : index
    %c0_38 = arith.constant 0 : index
    %80 = vector.load %arg3[%c9, %c0_38] : memref<16x32xf32, #tpu.memory_space<vmem>>, vector<1x32xf32>
    tpu.vector_store %arg3[%c9, %c0_38], %79 {strides = array<i32>} : memref<16x32xf32, #tpu.memory_space<vmem>>, vector<1x32xf32>,
    %c10_i32 = arith.constant 10 : i32
    %81 = arith.addi %0, %c10_i32 : i32
    %82 = arith.index_cast %81 : i32 to index
    %83 = memref.load %arg1[%82] : memref<16xi32, #tpu.memory_space<smem>>
    %c0_i32_39 = arith.constant 0 : i32
    %84 = arith.maxsi %83, %c0_i32_39 : i32
    %c31_i32_40 = arith.constant 31 : i32
    %85 = arith.minsi %84, %c31_i32_40 : i32
    %86 = arith.index_cast %85 : i32 to index
    %c0_41 = arith.constant 0 : index
    %87 = vector.load %arg2[%86, %c0_41] : memref<32x32xf32, #tpu.memory_space<vmem>>, vector<1x32xf32>
    %c10 = arith.constant 10 : index
    %c0_42 = arith.constant 0 : index
    %88 = vector.load %arg3[%c10, %c0_42] : memref<16x32xf32, #tpu.memory_space<vmem>>, vector<1x32xf32>
    tpu.vector_store %arg3[%c10, %c0_42], %87 {strides = array<i32>} : memref<16x32xf32, #tpu.memory_space<vmem>>, vector<1x32xf32>,
    %c11_i32 = arith.constant 11 : i32
    %89 = arith.addi %0, %c11_i32 : i32
    %90 = arith.index_cast %89 : i32 to index
    %91 = memref.load %arg1[%90] : memref<16xi32, #tpu.memory_space<smem>>
    %c0_i32_43 = arith.constant 0 : i32
    %92 = arith.maxsi %91, %c0_i32_43 : i32
    %c31_i32_44 = arith.constant 31 : i32
    %93 = arith.minsi %92, %c31_i32_44 : i32
    %94 = arith.index_cast %93 : i32 to index
    %c0_45 = arith.constant 0 : index
    %95 = vector.load %arg2[%94, %c0_45] : memref<32x32xf32, #tpu.memory_space<vmem>>, vector<1x32xf32>
    %c11 = arith.constant 11 : index
    %c0_46 = arith.constant 0 : index
    %96 = vector.load %arg3[%c11, %c0_46] : memref<16x32xf32, #tpu.memory_space<vmem>>, vector<1x32xf32>
    tpu.vector_store %arg3[%c11, %c0_46], %95 {strides = array<i32>} : memref<16x32xf32, #tpu.memory_space<vmem>>, vector<1x32xf32>,
    %c12_i32 = arith.constant 12 : i32
    %97 = arith.addi %0, %c12_i32 : i32
    %98 = arith.index_cast %97 : i32 to index
    %99 = memref.load %arg1[%98] : memref<16xi32, #tpu.memory_space<smem>>
    %c0_i32_47 = arith.constant 0 : i32
    %100 = arith.maxsi %99, %c0_i32_47 : i32
    %c31_i32_48 = arith.constant 31 : i32
    %101 = arith.minsi %100, %c31_i32_48 : i32
    %102 = arith.index_cast %101 : i32 to index
    %c0_49 = arith.constant 0 : index
    %103 = vector.load %arg2[%102, %c0_49] : memref<32x32xf32, #tpu.memory_space<vmem>>, vector<1x32xf32>
    %c12 = arith.constant 12 : index
    %c0_50 = arith.constant 0 : index
    %104 = vector.load %arg3[%c12, %c0_50] : memref<16x32xf32, #tpu.memory_space<vmem>>, vector<1x32xf32>
    tpu.vector_store %arg3[%c12, %c0_50], %103 {strides = array<i32>} : memref<16x32xf32, #tpu.memory_space<vmem>>, vector<1x32xf32>,
    %c13_i32 = arith.constant 13 : i32
    %105 = arith.addi %0, %c13_i32 : i32
    %106 = arith.index_cast %105 : i32 to index
    %107 = memref.load %arg1[%106] : memref<16xi32, #tpu.memory_space<smem>>
    %c0_i32_51 = arith.constant 0 : i32
    %108 = arith.maxsi %107, %c0_i32_51 : i32
    %c31_i32_52 = arith.constant 31 : i32
    %109 = arith.minsi %108, %c31_i32_52 : i32
    %110 = arith.index_cast %109 : i32 to index
    %c0_53 = arith.constant 0 : index
    %111 = vector.load %arg2[%110, %c0_53] : memref<32x32xf32, #tpu.memory_space<vmem>>, vector<1x32xf32>
    %c13 = arith.constant 13 : index
    %c0_54 = arith.constant 0 : index
    %112 = vector.load %arg3[%c13, %c0_54] : memref<16x32xf32, #tpu.memory_space<vmem>>, vector<1x32xf32>
    tpu.vector_store %arg3[%c13, %c0_54], %111 {strides = array<i32>} : memref<16x32xf32, #tpu.memory_space<vmem>>, vector<1x32xf32>,
    %c14_i32 = arith.constant 14 : i32
    %113 = arith.addi %0, %c14_i32 : i32
    %114 = arith.index_cast %113 : i32 to index
    %115 = memref.load %arg1[%114] : memref<16xi32, #tpu.memory_space<smem>>
    %c0_i32_55 = arith.constant 0 : i32
    %116 = arith.maxsi %115, %c0_i32_55 : i32
    %c31_i32_56 = arith.constant 31 : i32
    %117 = arith.minsi %116, %c31_i32_56 : i32
    %118 = arith.index_cast %117 : i32 to index
    %c0_57 = arith.constant 0 : index
    %119 = vector.load %arg2[%118, %c0_57] : memref<32x32xf32, #tpu.memory_space<vmem>>, vector<1x32xf32>
    %c14 = arith.constant 14 : index
    %c0_58 = arith.constant 0 : index
    %120 = vector.load %arg3[%c14, %c0_58] : memref<16x32xf32, #tpu.memory_space<vmem>>, vector<1x32xf32>
    tpu.vector_store %arg3[%c14, %c0_58], %119 {strides = array<i32>} : memref<16x32xf32, #tpu.memory_space<vmem>>, vector<1x32xf32>,
    %c15_i32 = arith.constant 15 : i32
    %121 = arith.addi %0, %c15_i32 : i32
    %122 = arith.index_cast %121 : i32 to index
    %123 = memref.load %arg1[%122] : memref<16xi32, #tpu.memory_space<smem>>
    %c0_i32_59 = arith.constant 0 : i32
    %124 = arith.maxsi %123, %c0_i32_59 : i32
    %c31_i32_60 = arith.constant 31 : i32
    %125 = arith.minsi %124, %c31_i32_60 : i32
    %126 = arith.index_cast %125 : i32 to index
    %c0_61 = arith.constant 0 : index
    %127 = vector.load %arg2[%126, %c0_61] : memref<32x32xf32, #tpu.memory_space<vmem>>, vector<1x32xf32>
    %c15 = arith.constant 15 : index
    %c0_62 = arith.constant 0 : index
    %128 = vector.load %arg3[%c15, %c0_62] : memref<16x32xf32, #tpu.memory_space<vmem>>, vector<1x32xf32>
    tpu.vector_store %arg3[%c15, %c0_62], %127 {strides = array<i32>} : memref<16x32xf32, #tpu.memory_space<vmem>>, vector<1x32xf32>,
    return
  }
  func.func @transform_0(%arg0: i32, %arg1: memref<16xi32, #tpu.memory_space<smem>>) -> (i32, i32) {
    %c0_i32 = arith.constant 0 : i32
    %c0_i32_0 = arith.constant 0 : i32
    %c0_i32_1 = arith.constant 0 : i32
    return %c0_i32, %c0_i32_0 : i32, i32
  }
  func.func @transform_1(%arg0: i32, %arg1: memref<16xi32, #tpu.memory_space<smem>>) -> (i32, i32) {
    %c0_i32 = arith.constant 0 : i32
    %c0_i32_0 = arith.constant 0 : i32
    return %arg0, %c0_i32 : i32, i32
  }
}

</mosaic_0001>

<bundles_post_ra>
// kernel: tpu_custom_call.1
= control target key start
LH: loop header
LB: loop body
LE: loop exit
PB: predicated region body
PF: predicated region fallthrough
CT: control target
= control target key end

     0   :  { %s392_s9 = smov [#allocation3]   ;;  %s463_s0 = inlined_call_operand.hbm [shape: s32[16], index: 0, kind: input, shape index: {}]   ;;  %s464_s1 = inlined_call_operand.hbm [shape: f32[32,32], index: 1, kind: input, shape index: {}]   ;;  %s465_s2 = inlined_call_operand.hbm [shape: f32[16,32], index: 2, kind: output, shape index: {}]  }
   0x1   :  { %8 = dma.hbm_to_smem %s463_s0, 16, %s392_s9, [#allocation2] }
   0x2   :  { %386 = dma.done.wait [#allocation2], 16 }
   0x3   :  { %387 = vsyncadd [#allocation2], 4294967280 }
   0x4   :  { %10 = sfence }
   0x5   :  { %11 = vsyncpa [#allocation5], 0 }
   0x6   :  { %12 = vsyncpa [#allocation6], 0  ;;  %s393_s12 = smov [#allocation4]  }
   0x7   :  { %s18_s13 = sshll.u32 %s393_s12, 4  ;;  %s19_s13 = int_to_ptr.vmem [resolvable:$true] %s18_s13 }
   0x8   :  { %s354_s14 = scalar_lea.vmem %s19_s13, 512  ;;  %p359_p1 = scmp.lt.s32.totalorder %s19_s13, %s19_s13 }
   0x9   :  { %p355_p0 = scmp.ne.s32.totalorder %s19_s13, %s354_s14  ;;  %p360_p2 = scmp.lt.s32.totalorder %s354_s14, %s354_s14 }
   0xb   :  { %p361_p3 = por %p360_p2, %p359_p1 }
   0xd   :  { %p362_p4 = pnand %p361_p3, %p355_p0 }
   0xf   :  { %365 = shalt.err (!%p362_p4)
}
  0x10   :  { %s394_s15 = smov 128   ;;  %s395_s16 = smov 8  }
  0x11   :  { %24 = dma.hbm_to_vmem [thread:$0]  %s464_s1, 512, %s19_s13, [#allocation5], %s394_s15, %s394_s15, %s395_s16  }
  0x12   :  { %388 = dma.done.wait [#allocation5], 512  }
  0x13   :  { %389 = vsyncadd [#allocation5], 4294966784  ;;  %s29_s18 = sld [smem:[#allocation3]]  ;;  %vm36_vm0 = vcmask 253952  }
  0x14   :  { %s211_s19 = sld [smem:[#allocation3 + $0x1]] }
  0x15   :  { %s217_s20 = sld [smem:[#allocation3 + $0x2]] }
  0x16   :  { %s223_s21 = sld [smem:[#allocation3 + $0x3]] }
  0x17   :  { %s421_s22 = sld [smem:[#allocation3 + $0x4]] }
  0x18   :  { %s423_s23 = sld [smem:[#allocation3 + $0x5]] }
  0x19   :  { %p30_p5 = scmp.gt.s32.totalorder %s29_s18, 0  ;;  %p206_p6 = scmp.lt.s32.totalorder %s29_s18, 31 }
  0x1a   :  { %p40_p7 = scmp.gt.s32.totalorder %s211_s19, 0  ;;  %p212_p8 = scmp.lt.s32.totalorder %s211_s19, 31 }
  0x1b   :  { %s467_s18 = smov (!%p30_p5, %s29_s18), 0  ;;  %p49_p9 = scmp.gt.s32.totalorder %s217_s20, 0 }
  0x1c   :  { %s469_s19 = smov (!%p40_p7, %s211_s19), 0  ;;  %s471_s18 = smov (!%p206_p6, %s467_s18), 31 }
  0x1d   :  { %s473_s19 = smov (!%p212_p8, %s469_s19), 31  ;;  %s34_s1 = scalar_lea.vmem [#allocation4], %s471_s18 }
  0x1e   :  { %v35_v0 = vld [vmem:[%s34_s1] sm:$0x1]  ;;  %p218_p10 = scmp.lt.s32.totalorder %s217_s20, 31  ;;  %s44_s24 = scalar_lea.vmem [#allocation4], %s473_s19 }
  0x1f   :  { %37 = vst.msk [vmem:[#allocation7] sm:$0x1] %vm36_vm0, %v35_v0  ;;  %v45_v1 = vld [vmem:[%s44_s24] sm:$0x1]  ;;  %s475_s20 = smov (!%p49_p9, %s217_s20), 0  ;;  %p58_p11 = scmp.gt.s32.totalorder %s223_s21, 0 }
  0x20   :  { %46 = vst.msk [vmem:[#allocation7 + $0x1] sm:$0x1] %vm36_vm0, %v45_v1  ;;  %p224_p12 = scmp.lt.s32.totalorder %s223_s21, 31  ;;  %s477_s20 = smov (!%p218_p10, %s475_s20), 31 }
  0x21   :  { %s479_s21 = smov (!%p58_p11, %s223_s21), 0  ;;  %p67_p13 = scmp.gt.s32.totalorder %s421_s22, 0 }
  0x22   :  { %s53_s25 = scalar_lea.vmem [#allocation4], %s477_s20  ;;  %s481_s21 = smov (!%p224_p12, %s479_s21), 31 }
  0x23   :  { %v54_v2 = vld [vmem:[%s53_s25] sm:$0x1]  ;;  %s68_s26 = scalar_select %p67_p13, %s421_s22, 0 }
  0x24   :  { %55 = vst.msk [vmem:[#allocation7 + $0x2] sm:$0x1] %vm36_vm0, %v54_v2  ;;  %p230_p0 = scmp.lt.s32.totalorder %s421_s22, 31  ;;  %s62_s27 = scalar_lea.vmem [#allocation4], %s481_s21 }
  0x25   :  { %v63_v3 = vld [vmem:[%s62_s27] sm:$0x1]  ;;  %p76_p1 = scmp.gt.s32.totalorder %s423_s23, 0  ;;  %p236_p2 = scmp.lt.s32.totalorder %s423_s23, 31 }
  0x26   :  { %64 = vst.msk [vmem:[#allocation7 + $0x3] sm:$0x1] %vm36_vm0, %v63_v3  ;;  %s483_s26 = smov (!%p230_p0, %s68_s26), 31  ;;  %s241_s28 = sld [smem:[#allocation3 + $0x6]] }
  0x27   :  { %s485_s23 = smov (!%p76_p1, %s423_s23), 0  ;;  %s71_s29 = scalar_lea.vmem [#allocation4], %s483_s26 }
  0x28   :  { %v72_v4 = vld [vmem:[%s71_s29] sm:$0x1]  ;;  %s487_s23 = smov (!%p236_p2, %s485_s23), 31  ;;  %s247_s30 = sld [smem:[#allocation3 + $0x7]] }
  0x29   :  { %73 = vst.msk [vmem:[#allocation7 + $0x4] sm:$0x1] %vm36_vm0, %v72_v4  ;;  %s253_s3 = sld [smem:[#allocation3 + $0x8]]  ;;  %s80_s4 = scalar_lea.vmem [#allocation4], %s487_s23 }
  0x2a   :  { %v81_v5 = vld [vmem:[%s80_s4] sm:$0x1]  ;;  %s259_s5 = sld [smem:[#allocation3 + $0x9]]  ;;  %s396_s1 = smov [#allocation7]  }
  0x2b   :  { %82 = vst.msk [vmem:[#allocation7 + $0x5] sm:$0x1] %vm36_vm0, %v81_v5  ;;  %s437_s6 = sld [smem:[#allocation3 + $0xa]]  ;;  %s178_s24 = sshll.u32 %s396_s1, 4  ;;  %s179_s24 = int_to_ptr.vmem [resolvable:$true] %s178_s24 }
  0x2c   :  { %p85_p3 = scmp.gt.s32.totalorder %s241_s28, 0  ;;  %p242_p4 = scmp.lt.s32.totalorder %s241_s28, 31 }
  0x2d   :  { %s439_s7 = sld [smem:[#allocation3 + $0xb]]  ;;  %s366_s27 = scalar_lea.vmem %s179_s24, 256 }
  0x2e   :  { %s489_s28 = smov (!%p85_p3, %s241_s28), 0  ;;  %p94_p5 = scmp.gt.s32.totalorder %s247_s30, 0 }
  0x2f   :  { %p248_p6 = scmp.lt.s32.totalorder %s247_s30, 31  ;;  %s491_s28 = smov (!%p242_p4, %s489_s28), 31 }
  0x30   :  { %s493_s30 = smov (!%p94_p5, %s247_s30), 0  ;;  %p103_p7 = scmp.gt.s32.totalorder %s253_s3, 0 }
  0x31   :  { %s89_s8 = scalar_lea.vmem [#allocation4], %s491_s28  ;;  %s495_s30 = smov (!%p248_p6, %s493_s30), 31 }
  0x32   :  { %v90_v6 = vld [vmem:[%s89_s8] sm:$0x1]  ;;  %s104_s9 = scalar_select %p103_p7, %s253_s3, 0 }
  0x33   :  { %91 = vst.msk [vmem:[#allocation7 + $0x6] sm:$0x1] %vm36_vm0, %v90_v6  ;;  %p254_p8 = scmp.lt.s32.totalorder %s253_s3, 31  ;;  %s98_s10 = scalar_lea.vmem [#allocation4], %s495_s30 }
  0x34   :  { %v99_v7 = vld [vmem:[%s98_s10] sm:$0x1]  ;;  %p112_p9 = scmp.gt.s32.totalorder %s259_s5, 0  ;;  %p260_p10 = scmp.lt.s32.totalorder %s259_s5, 31 }
  0x35   :  { %100 = vst.msk [vmem:[#allocation7 + $0x7] sm:$0x1] %vm36_vm0, %v99_v7  ;;  %s497_s9 = smov (!%p254_p8, %s104_s9), 31  ;;  %p121_p11 = scmp.gt.s32.totalorder %s437_s6, 0 }
  0x36   :  { %s499_s5 = smov (!%p112_p9, %s259_s5), 0  ;;  %s107_s11 = scalar_lea.vmem [#allocation4], %s497_s9 }
  0x37   :  { %v108_v8 = vld [vmem:[%s107_s11] sm:$0x1]  ;;  %s501_s5 = smov (!%p260_p10, %s499_s5), 31  ;;  %p266_p12 = scmp.lt.s32.totalorder %s437_s6, 31 }
  0x38   :  { %109 = vst.msk [vmem:[#allocation7 + $0x8] sm:$0x1] %vm36_vm0, %v108_v8  ;;  %s122_s12 = scalar_select %p121_p11, %s437_s6, 0 }
  0x39   :  { %s116_s13 = scalar_lea.vmem [#allocation4], %s501_s5  ;;  %p130_p13 = scmp.gt.s32.totalorder %s439_s7, 0 }
  0x3a   :  { %v117_v9 = vld [vmem:[%s116_s13] sm:$0x1]  ;;  %p272_p0 = scmp.lt.s32.totalorder %s439_s7, 31  ;;  %s503_s12 = smov (!%p266_p12, %s122_s12), 31 }
  0x3b   :  { %118 = vst.msk [vmem:[#allocation7 + $0x9] sm:$0x1] %vm36_vm0, %v117_v9  ;;  %s505_s7 = smov (!%p130_p13, %s439_s7), 0  ;;  %s277_s14 = sld [smem:[#allocation3 + $0xc]] }
  0x3c   :  { %s125_s0 = scalar_lea.vmem [#allocation4], %s503_s12  ;;  %s507_s7 = smov (!%p272_p0, %s505_s7), 31 }
  0x3d   :  { %v126_v10 = vld [vmem:[%s125_s0] sm:$0x1]  ;;  %s283_s17 = sld [smem:[#allocation3 + $0xd]]  ;;  %s134_s18 = scalar_lea.vmem [#allocation4], %s507_s7 }
  0x3e   :  { %127 = vst.msk [vmem:[#allocation7 + $0xa] sm:$0x1] %vm36_vm0, %v126_v10  ;;  %v135_v11 = vld [vmem:[%s134_s18] sm:$0x1]  ;;  %s289_s19 = sld [smem:[#allocation3 + $0xe]]  ;;  %p367_p9 = scmp.ne.s32.totalorder %s179_s24, %s366_s27 }
  0x3f   :  { %136 = vst.msk [vmem:[#allocation7 + $0xb] sm:$0x1] %vm36_vm0, %v135_v11  ;;  %s295_s20 = sld [smem:[#allocation3 + $0xf]]  ;;  %p371_p10 = scmp.lt.s32.totalorder %s179_s24, %s179_s24 }
  0x40   :  { %p372_p11 = scmp.lt.s32.totalorder %s366_s27, %s366_s27 }
  0x41   :  { %p139_p1 = scmp.gt.s32.totalorder %s277_s14, 0  ;;  %p278_p2 = scmp.lt.s32.totalorder %s277_s14, 31 }
  0x42   :  { %p373_p12 = por %p372_p11, %p371_p10 }
  0x43   :  { %s509_s14 = smov (!%p139_p1, %s277_s14), 0  ;;  %p148_p3 = scmp.gt.s32.totalorder %s283_s17, 0 }
  0x44   :  { %p284_p4 = scmp.lt.s32.totalorder %s283_s17, 31  ;;  %s511_s14 = smov (!%p278_p2, %s509_s14), 31 }
  0x45   :  { %s513_s17 = smov (!%p148_p3, %s283_s17), 0  ;;  %p157_p5 = scmp.gt.s32.totalorder %s289_s19, 0 }
  0x46   :  { %s143_s21 = scalar_lea.vmem [#allocation4], %s511_s14  ;;  %s515_s17 = smov (!%p284_p4, %s513_s17), 31 }
  0x47   :  { %v144_v12 = vld [vmem:[%s143_s21] sm:$0x1]  ;;  %s158_s22 = scalar_select %p157_p5, %s289_s19, 0 }
  0x48   :  { %145 = vst.msk [vmem:[#allocation7 + $0xc] sm:$0x1] %vm36_vm0, %v144_v12  ;;  %p290_p6 = scmp.lt.s32.totalorder %s289_s19, 31  ;;  %s152_s23 = scalar_lea.vmem [#allocation4], %s515_s17 }
  0x49   :  { %v153_v13 = vld [vmem:[%s152_s23] sm:$0x1]  ;;  %p166_p7 = scmp.gt.s32.totalorder %s295_s20, 0  ;;  %p296_p8 = scmp.lt.s32.totalorder %s295_s20, 31 }
  0x4a   :  { %154 = vst.msk [vmem:[#allocation7 + $0xd] sm:$0x1] %vm36_vm0, %v153_v13  ;;  %s517_s22 = smov (!%p290_p6, %s158_s22), 31  ;;  %p374_p13 = pnand %p373_p12, %p367_p9 }
  0x4b   :  { %s519_s20 = smov (!%p166_p7, %s295_s20), 0  ;;  %s161_s25 = scalar_lea.vmem [#allocation4], %s517_s22 }
  0x4c   :  { %v162_v14 = vld [vmem:[%s161_s25] sm:$0x1]  ;;  %s521_s20 = smov (!%p296_p8, %s519_s20), 31 }
  0x4d   :  { %163 = vst.msk [vmem:[#allocation7 + $0xe] sm:$0x1] %vm36_vm0, %v162_v14  ;;  %s170_s26 = scalar_lea.vmem [#allocation4], %s521_s20 }
  0x4e   :  { %v171_v15 = vld [vmem:[%s170_s26] sm:$0x1] }
  0x4f   :  { %172 = vst.msk [vmem:[#allocation7 + $0xf] sm:$0x1] %vm36_vm0, %v171_v15 }
  0x50   :  { %377 = shalt.err (!%p374_p13)
}
  0x51   :  { %184 = dma.vmem_to_hbm [thread:$0]  %s179_s24, 256, %s465_s2, [#allocation6], %s394_s15, %s394_s15, %s395_s16  }
  0x52   :  { %390 = dma.done.wait [#allocation6], 256  }
  0x53   :  { %391 = vsyncadd [#allocation6], 4294967040 }
  0x54   :  { %188 = vsyncpa [#allocation5], 1 }
  0x55   :  { %189 = vsyncpa [#allocation6], 1 }

</bundles_post_ra>
